<compile_context>
chip_gen: v5e
topology: v5e:2x2
jax: 0.10.0
libtpu: 0.0.40
codegen_flags: <defaults>
</compile_context>

<pallas_src>
import functools
import math

import jax
import jax.numpy as jnp
from jax import lax
from jax.experimental import pallas as pl
from jax.experimental.pallas import tpu as pltpu


# ------------------------------ small helpers ------------------------------ #

def _pick_tile(dim, candidates):
    """Largest candidate that evenly divides `dim`; else fall back to full dim."""
    for c in candidates:
        if dim >= c and dim % c == 0:
            return c
    # TODO(synk): pad + edge-mask instead of the full-dim fallback so large,
    # non-divisible dims don't collapse into a single VMEM-heavy block (matters
    # most on v7x's 64 MiB VMEM for long sequences).
    return dim


@functools.lru_cache(maxsize=None)
def _vmem_limit_bytes():
    """Per-generation scoped VMEM budget (~3/4 of physical, capped at 96 MiB).

    v5e/v6e (128 MiB physical) -> 96 MiB; v7x (64 MiB physical) -> 48 MiB.
    """
    try:
        cap = int(pltpu.get_tpu_info().vmem_capacity_bytes)
    except Exception:  # pragma: no cover - conservative fallback
        cap = 64 * 1024 * 1024
    return max(32 * 1024 * 1024, min(cap * 3 // 4, 96 * 1024 * 1024))


# ------------- fused per-head QKV projection (layout fused in) -------------- #
#
# Computes, for every (batch, row-tile, j*H+h) grid point:
#     qkv_heads[j*H+h, b, rows, :] = x[b, rows, :] @ w_r[j*H+h] + b_r[j*H+h]
# i.e. the QKV linear already emitted in the [3H, B, S, hd] layout attention
# consumes, so no transpose pass and no packed-width over-fetch downstream.

def _qkv_proj_kernel(x_ref, w_ref, b_ref, o_ref):
    acc = jnp.dot(x_ref[...], w_ref[...], preferred_element_type=jnp.float32)
    o_ref[...] = (acc + b_ref[...].astype(jnp.float32)).astype(o_ref.dtype)


def pallas_qkv_projection(x, w_r, b_r, num_heads):
    """x: [B,S,D], w_r: [3H,D,hd], b_r: [3H,1,hd] -> qkv_heads [3H,B,S,hd]."""
    B, S, D = x.shape
    three_h, D2, hd = w_r.shape
    assert D2 == D and three_h == 3 * num_heads

    tm = _pick_tile(S, (512, 256, 128))
    itemsize = x.dtype.itemsize
    cost = pl.CostEstimate(
        flops=2 * B * S * D * 3 * D,
        bytes_accessed=(B * S * D + 3 * D * D + B * S * 3 * D) * itemsize,
        transcendentals=0,
    )

    # TODO(synk): tile K (=D) for very large d_model; K is kept un-tiled here so
    # the x row-panel index map is independent of the innermost head axis and
    # Pallas can skip re-fetching it across the 3H per-head matmuls.
    return pl.pallas_call(
        _qkv_proj_kernel,
        out_shape=jax.ShapeDtypeStruct((three_h, B, S, hd), x.dtype),
        grid=(B, S // tm, three_h),
        in_specs=[
            # x row panel: constant across the (innermost) head axis -> fetched once.
            pl.BlockSpec((None, tm, D), lambda b, mi, jh: (b, mi, 0)),
            pl.BlockSpec((None, D, hd), lambda b, mi, jh: (jh, 0, 0)),
            pl.BlockSpec((None, 1, hd), lambda b, mi, jh: (jh, 0, 0)),
        ],
        out_specs=pl.BlockSpec((None, None, tm, hd),
                               lambda b, mi, jh: (jh, b, mi, 0)),
        compiler_params=pltpu.CompilerParams(
            dimension_semantics=("parallel", "parallel", "parallel"),
            vmem_limit_bytes=_vmem_limit_bytes()),
        cost_estimate=cost,
    )(x, w_r, b_r)


# ------------------- flash attention over [3H, B, S, hd] -------------------- #

def _flash_attention_kernel(q_ref, k_ref, v_ref, o_ref, m_ref, l_ref, acc_ref):
    kv_i = pl.program_id(3)

    @pl.when(kv_i == 0)
    def _init():
        m_ref[...] = jnp.full_like(m_ref, -jnp.inf)
        l_ref[...] = jnp.zeros_like(l_ref)
        acc_ref[...] = jnp.zeros_like(acc_ref)

    q = q_ref[...]                         # [tq, hd]  (scale folded into weights)
    k = k_ref[...]                         # [tkv, hd]
    v = v_ref[...]                         # [tkv, hd]

    # q @ k^T without an explicit transpose: contract the last dims on the MXU.
    s = lax.dot_general(q, k, (((1,), (1,)), ((), ())),
                        preferred_element_type=jnp.float32)   # [tq, tkv] f32

    # TODO(synk): additive `mask` path (permute/add/permute), dropout and the
    # attention-weights return are not implemented; mask=None eval path only.
    m_prev = m_ref[...]
    m_new = jnp.maximum(m_prev, jnp.max(s, axis=-1, keepdims=True))
    alpha = jnp.exp(m_prev - m_new)                            # f32 VPU/EUP
    p = jnp.exp(s - m_new)
    l_ref[...] = alpha * l_ref[...] + jnp.sum(p, axis=-1, keepdims=True)
    acc_ref[...] = alpha * acc_ref[...] + jnp.dot(
        p.astype(v.dtype), v, preferred_element_type=jnp.float32)
    m_ref[...] = m_new

    @pl.when(kv_i == pl.num_programs(3) - 1)
    def _finalize():
        inv_l = pl.reciprocal(l_ref[...], approx=True)         # EUP slot
        o_ref[...] = (acc_ref[...] * inv_l).astype(o_ref.dtype)


def pallas_flash_attention(qkv_heads, num_heads):
    """qkv_heads: [3H, B, S, hd] (rows 0..H-1 = q, H..2H-1 = k, 2H..3H-1 = v)."""
    three_h, B, S, hd = qkv_heads.shape
    H = num_heads
    assert three_h == 3 * H

    tq = _pick_tile(S, (512, 256, 128))
    tkv = _pick_tile(S, (512, 256, 128))

    itemsize = qkv_heads.dtype.itemsize
    cost = pl.CostEstimate(
        flops=4 * B * H * S * S * hd,
        bytes_accessed=(3 * B * H * S * hd + B * H * S * hd) * itemsize,
        transcendentals=B * H * S * S,
    )

    # TODO(synk): when hd < 128 the output stores are lane-sparse (masked vst);
    # packing multiple heads per output block would make them lane-dense.
    # NOTE: for v5e, consider pipeline_mode=pl.Buffered(3) on the k/v specs if
    # the bundle shows exposed DMA.
    return pl.pallas_call(
        _flash_attention_kernel,
        out_shape=jax.ShapeDtypeStruct((B, H, S, hd), qkv_heads.dtype),
        grid=(B, H, S // tq, S // tkv),
        in_specs=[
            # Exact hd-wide q/k/v blocks: no packed-width over-fetch, no
            # in-kernel lane-offset slicing.  q is constant across the kv axis.
            pl.BlockSpec((None, None, tq, hd),
                         lambda b, h, qi, ki: (h, b, qi, 0)),
            pl.BlockSpec((None, None, tkv, hd),
                         lambda b, h, qi, ki: (H + h, b, ki, 0)),
            pl.BlockSpec((None, None, tkv, hd),
                         lambda b, h, qi, ki: (2 * H + h, b, ki, 0)),
        ],
        out_specs=pl.BlockSpec((None, None, tq, hd),
                               lambda b, h, qi, ki: (b, h, qi, 0)),
        scratch_shapes=[
            pltpu.VMEM((tq, 1), jnp.float32),    # running max m
            pltpu.VMEM((tq, 1), jnp.float32),    # running sum l
            pltpu.VMEM((tq, hd), jnp.float32),   # f32 accumulator
        ],
        compiler_params=pltpu.CompilerParams(
            dimension_semantics=("parallel", "parallel", "parallel",
                                 "arbitrary"),
            vmem_limit_bytes=_vmem_limit_bytes()),
        cost_estimate=cost,
    )(qkv_heads, qkv_heads, qkv_heads)


# --------------------- tiled linear: y = x @ w + b (MNK) --------------------- #

def _linear_kernel(x_ref, w_ref, b_ref, o_ref, acc_ref):
    k = pl.program_id(2)

    @pl.when(k == 0)
    def _init():
        acc_ref[...] = jnp.zeros_like(acc_ref)

    acc_ref[...] += jnp.dot(x_ref[...], w_ref[...],
                            preferred_element_type=jnp.float32)

    @pl.when(k == pl.num_programs(2) - 1)
    def _finalize():
        o_ref[...] = (acc_ref[...]
                      + b_ref[...].astype(jnp.float32)).astype(o_ref.dtype)


def pallas_linear(x2d, w, b, out_dtype=None):
    """y = x2d @ w + b   (x2d: [M, K], w: [K, N], b: [N])."""
    M, K = x2d.shape
    K2, N = w.shape
    assert K == K2
    if out_dtype is None:
        out_dtype = x2d.dtype

    tm = _pick_tile(M, (512, 256, 128))
    tn = _pick_tile(N, (512, 256, 128))
    tk = _pick_tile(K, (1024, 512, 256, 128))
    b2d = b.reshape(1, N)

    itemsize = x2d.dtype.itemsize
    cost = pl.CostEstimate(
        flops=2 * M * N * K,
        bytes_accessed=(M * K + K * N + M * N + N) * itemsize,
        transcendentals=0,
    )

    return pl.pallas_call(
        _linear_kernel,
        out_shape=jax.ShapeDtypeStruct((M, N), out_dtype),
        grid=(M // tm, N // tn, K // tk),
        in_specs=[
            pl.BlockSpec((tm, tk), lambda i, j, k: (i, k)),
            pl.BlockSpec((tk, tn), lambda i, j, k: (k, j)),
            pl.BlockSpec((1, tn), lambda i, j, k: (0, j)),
        ],
        out_specs=pl.BlockSpec((tm, tn), lambda i, j, k: (i, j)),
        scratch_shapes=[pltpu.VMEM((tm, tn), jnp.float32)],
        compiler_params=pltpu.CompilerParams(
            dimension_semantics=("parallel", "parallel", "arbitrary"),
            vmem_limit_bytes=_vmem_limit_bytes()),
        cost_estimate=cost,
    )(x2d, w, b2d)


# ------------------------------ module wrapper ------------------------------ #

def init_params(key, d_model):
    k1, k2, k3, k4 = jax.random.split(key, 4)
    scale = 1.0 / math.sqrt(d_model)
    return {
        "w_qkv": jax.random.uniform(k1, (d_model, 3 * d_model), jnp.float32,
                                    -scale, scale),
        "b_qkv": jax.random.uniform(k2, (3 * d_model,), jnp.float32, -scale,
                                    scale),
        "w_out": jax.random.uniform(k3, (d_model, d_model), jnp.float32,
                                    -scale, scale),
        "b_out": jax.random.uniform(k4, (d_model,), jnp.float32, -scale, scale),
    }


def _split_qkv_weights(w_qkv, b_qkv, num_heads, head_dim, q_scale, dtype):
    """Rearrange packed [D,3D] QKV weights into per-head [3H,D,hd] (+ bias),
    folding the 1/sqrt(hd) scale into the q weights/bias (weight-sized work)."""
    D = w_qkv.shape[0]
    w4 = w_qkv.reshape(D, num_heads, 3, head_dim)          # [D, H, 3, hd]
    w4 = jnp.transpose(w4, (2, 1, 0, 3))                   # [3, H, D, hd]
    b3 = b_qkv.reshape(num_heads, 3, head_dim)             # [H, 3, hd]
    b3 = jnp.transpose(b3, (1, 0, 2))                      # [3, H, hd]
    scale_vec = jnp.asarray([q_scale, 1.0, 1.0], w4.dtype).reshape(3, 1, 1, 1)
    w4 = w4 * scale_vec
    b3 = b3 * scale_vec.reshape(3, 1, 1)
    w_r = w4.reshape(3 * num_heads, D, head_dim).astype(dtype)
    b_r = b3.reshape(3 * num_heads, 1, head_dim).astype(dtype)
    return w_r, b_r


def multihead_attention_forward(params, x, num_heads,
                                compute_dtype=jnp.bfloat16):
    """Forward pass of the PyTorch MultiheadAttention module (mask=None).

    Default compute path is bf16 (MXU operands) with f32 accumulation and f32
    softmax statistics; pass compute_dtype=jnp.float32 for full-precision.
    # TODO(synk): fp8 operand path for the projections on v7x.
    """
    B, S, D = x.shape
    hd = D // num_heads
    assert D == num_heads * hd
    out_dtype = x.dtype
    cdt = x.dtype if compute_dtype is None else compute_dtype

    q_scale = 1.0 / math.sqrt(hd)
    w_r, b_r = _split_qkv_weights(params["w_qkv"], params["b_qkv"],
                                  num_heads, hd, q_scale, cdt)

    x_c = x.astype(cdt)

    # Fused QKV projection, emitted directly in per-head layout [3H, B, S, hd].
    qkv_heads = pallas_qkv_projection(x_c, w_r, b_r, num_heads)

    # KV-tiled online-softmax attention -> [B, H, S, hd].
    values = pallas_flash_attention(qkv_heads, num_heads)

    # Reference module reshapes [B, H, S, hd] -> [B, S, H*hd] WITHOUT moving
    # heads back next to the feature dim -- match that exactly (free reshape).
    values2d = values.reshape(B * S, num_heads * hd)

    # Output projection (tiled, pipelined Pallas matmul), final cast to x.dtype.
    out = pallas_linear(values2d, params["w_out"].astype(cdt),
                        params["b_out"].astype(cdt), out_dtype=out_dtype)
    return out.reshape(B, S, D)


# Pure-JAX reference mirroring the PyTorch code path (for correctness check).
def reference_forward(params, x, num_heads):
    B, S, D = x.shape
    hd = D // num_heads
    qkv = x.reshape(B * S, D) @ params["w_qkv"] + params["b_qkv"]
    qkv = qkv.reshape(B, S, num_heads, 3 * hd).transpose(0, 2, 1, 3)
    q, k, v = jnp.split(qkv, 3, axis=-1)
    s = jnp.einsum("bhqd,bhkd->bhqk", q, k) / math.sqrt(hd)
    p = jax.nn.softmax(s, axis=-1)
    vals = jnp.einsum("bhqk,bhkd->bhqd", p, v)
    vals = vals.reshape(B * S, D)
    return (vals @ params["w_out"] + params["b_out"]).reshape(B, S, D)


if __name__ == "__main__":
    B, S, D, H = 2, 8, 32, 4

    key = jax.random.PRNGKey(0)
    kp, kx = jax.random.split(key)
    params = init_params(kp, D)
    x = jax.random.normal(kx, (B, S, D), jnp.float32)

    forward = jax.jit(multihead_attention_forward,
                      static_argnames=("num_heads", "compute_dtype"))
    ref = reference_forward(params, x, H)

    # Full-precision path: tight check (tolerance covers the approx reciprocal).
    out_f32 = jax.block_until_ready(
        forward(params, x, num_heads=H, compute_dtype=jnp.float32))
    assert out_f32.shape == (B, S, D)
    assert jnp.allclose(out_f32, ref, atol=5e-3, rtol=5e-3), "f32 mismatch"

    # Default bf16 path: looser check (bf16 MXU operands, f32 accumulation).
    out_bf16 = jax.block_until_ready(forward(params, x, num_heads=H))
    assert out_bf16.shape == (B, S, D)
    assert out_bf16.dtype == x.dtype
    assert jnp.allclose(out_bf16, ref, atol=6e-2, rtol=6e-2), "bf16 mismatch"

    print("KERNEL_OK")
</pallas_src>

<mosaic_0001>
module attributes {stable_mosaic.version = 11 : i64} {
  func.func @_qkv_proj_kernel(%arg0: i32, %arg1: i32, %arg2: i32, %arg3: memref<1x8x32xf32, #tpu.memory_space<vmem>>, %arg4: memref<1x32x8xf32, #tpu.memory_space<vmem>>, %arg5: memref<1x1x8xf32, #tpu.memory_space<vmem>>, %arg6: memref<1x1x8x8xf32, #tpu.memory_space<vmem>>) attributes {dimension_semantics = [#tpu.dimension_semantics<parallel>, #tpu.dimension_semantics<parallel>, #tpu.dimension_semantics<parallel>], iteration_bounds = array<i64: 2, 1, 12>, scalar_prefetch = 0 : i64, scratch_operands = 0 : i64, tpu.core_type = #tpu.core_type<tc>, window_params = [{transform_indices = @transform_0, window_bounds = array<i64: 1, 8, 32>}, {transform_indices = @transform_1, window_bounds = array<i64: 1, 32, 8>}, {transform_indices = @transform_2, window_bounds = array<i64: 1, 1, 8>}, {transform_indices = @transform_3, window_bounds = array<i64: 1, 1, 8, 8>}]} {
    %c0 = arith.constant 0 : index
    %c0_0 = arith.constant 0 : index
    %c0_1 = arith.constant 0 : index
    %0 = vector.load %arg3[%c0, %c0_0, %c0_1] : memref<1x8x32xf32, #tpu.memory_space<vmem>>, vector<1x8x32xf32>
    %1 = vector.shape_cast %0 : vector<1x8x32xf32> to vector<8x32xf32>
    %c0_2 = arith.constant 0 : index
    %c0_3 = arith.constant 0 : index
    %c0_4 = arith.constant 0 : index
    %2 = vector.load %arg4[%c0_2, %c0_3, %c0_4] : memref<1x32x8xf32, #tpu.memory_space<vmem>>, vector<1x32x8xf32>
    %3 = vector.shape_cast %2 : vector<1x32x8xf32> to vector<32x8xf32>
    %cst = arith.constant dense<0.000000e+00> : vector<8x8xf32>
    %4 = tpu.matmul %1, %3, %cst {dimension_numbers = #tpu.dot_dimension_numbers<[1], [0], [0], [1], [0, 0, 1, 1], [], []>} : vector<8x32xf32>, vector<32x8xf32>, vector<8x8xf32> -> vector<8x8xf32>
    %c0_5 = arith.constant 0 : index
    %c0_6 = arith.constant 0 : index
    %c0_7 = arith.constant 0 : index
    %5 = vector.load %arg5[%c0_5, %c0_6, %c0_7] : memref<1x1x8xf32, #tpu.memory_space<vmem>>, vector<1x1x8xf32>
    %6 = vector.shape_cast %5 : vector<1x1x8xf32> to vector<1x8xf32>
    %7 = vector.broadcast %6 : vector<1x8xf32> to vector<8x8xf32>
    %8 = arith.addf %4, %7 : vector<8x8xf32>
    %c0_8 = arith.constant 0 : index
    %c0_9 = arith.constant 0 : index
    %c0_10 = arith.constant 0 : index
    %c0_11 = arith.constant 0 : index
    %9 = vector.load %arg6[%c0_8, %c0_9, %c0_10, %c0_11] : memref<1x1x8x8xf32, #tpu.memory_space<vmem>>, vector<1x1x8x8xf32>
    %10 = vector.shape_cast %9 : vector<1x1x8x8xf32> to vector<8x8xf32>
    %11 = vector.shape_cast %8 : vector<8x8xf32> to vector<1x1x8x8xf32>
    tpu.vector_store %arg6[%c0_8, %c0_9, %c0_10, %c0_11], %11 {strides = array<i32>} : memref<1x1x8x8xf32, #tpu.memory_space<vmem>>, vector<1x1x8x8xf32>,
    return
  }
  func.func @transform_0(%arg0: i32, %arg1: i32, %arg2: i32) -> (i32, i32, i32) {
    %c0_i32 = arith.constant 0 : i32
    %c0_i32_0 = arith.constant 0 : i32
    return %arg0, %arg1, %c0_i32 : i32, i32, i32
  }
  func.func @transform_1(%arg0: i32, %arg1: i32, %arg2: i32) -> (i32, i32, i32) {
    %c0_i32 = arith.constant 0 : i32
    %c0_i32_0 = arith.constant 0 : i32
    %c0_i32_1 = arith.constant 0 : i32
    return %arg2, %c0_i32, %c0_i32_0 : i32, i32, i32
  }
  func.func @transform_2(%arg0: i32, %arg1: i32, %arg2: i32) -> (i32, i32, i32) {
    %c0_i32 = arith.constant 0 : i32
    %c0_i32_0 = arith.constant 0 : i32
    %c0_i32_1 = arith.constant 0 : i32
    return %arg2, %c0_i32, %c0_i32_0 : i32, i32, i32
  }
  func.func @transform_3(%arg0: i32, %arg1: i32, %arg2: i32) -> (i32, i32, i32, i32) {
    %c0_i32 = arith.constant 0 : i32
    %c0_i32_0 = arith.constant 0 : i32
    return %arg2, %arg0, %arg1, %c0_i32 : i32, i32, i32, i32
  }
}

module attributes {stable_mosaic.version = 11 : i64} {
  func.func @_flash_attention_kernel(%arg0: i32, %arg1: i32, %arg2: i32, %arg3: i32, %arg4: memref<1x1x8x8xf32, #tpu.memory_space<vmem>>, %arg5: memref<1x1x8x8xf32, #tpu.memory_space<vmem>>, %arg6: memref<1x1x8x8xf32, #tpu.memory_space<vmem>>, %arg7: memref<1x1x8x8xf32, #tpu.memory_space<vmem>>, %arg8: memref<8x1xf32, #tpu.memory_space<vmem>>, %arg9: memref<8x1xf32, #tpu.memory_space<vmem>>, %arg10: memref<8x8xf32, #tpu.memory_space<vmem>>) attributes {dimension_semantics = [#tpu.dimension_semantics<parallel>, #tpu.dimension_semantics<parallel>, #tpu.dimension_semantics<parallel>, #tpu.dimension_semantics<arbitrary>], iteration_bounds = array<i64: 2, 4, 1, 1>, scalar_prefetch = 0 : i64, scratch_operands = 3 : i64, tpu.core_type = #tpu.core_type<tc>, window_params = [{transform_indices = @transform_0, window_bounds = array<i64: 1, 1, 8, 8>}, {transform_indices = @transform_1, window_bounds = array<i64: 1, 1, 8, 8>}, {transform_indices = @transform_2, window_bounds = array<i64: 1, 1, 8, 8>}, {transform_indices = @transform_3, window_bounds = array<i64: 1, 1, 8, 8>}]} {
    %c0_i32 = arith.constant 0 : i32
    %0 = arith.cmpi eq, %arg3, %c0_i32 : i32
    %1 = arith.extui %0 : i1 to i32
    %c0_i32_0 = arith.constant 0 : i32
    %2 = arith.cmpi ne, %1, %c0_i32_0 : i32
    scf.if %2 {
      %cst_29 = arith.constant 0xFF800000 : f32
      %35 = vector.broadcast %cst_29 : f32 to vector<8x1xf32>
      %c0_30 = arith.constant 0 : index
      %c0_31 = arith.constant 0 : index
      %36 = vector.load %arg8[%c0_30, %c0_31] : memref<8x1xf32, #tpu.memory_space<vmem>>, vector<8x1xf32>
      tpu.vector_store %arg8[%c0_30, %c0_31], %35 {strides = array<i32>} : memref<8x1xf32, #tpu.memory_space<vmem>>, vector<8x1xf32>,
      %cst_32 = arith.constant 0.000000e+00 : f32
      %37 = vector.broadcast %cst_32 : f32 to vector<8x1xf32>
      %c0_33 = arith.constant 0 : index
      %c0_34 = arith.constant 0 : index
      %38 = vector.load %arg9[%c0_33, %c0_34] : memref<8x1xf32, #tpu.memory_space<vmem>>, vector<8x1xf32>
      tpu.vector_store %arg9[%c0_33, %c0_34], %37 {strides = array<i32>} : memref<8x1xf32, #tpu.memory_space<vmem>>, vector<8x1xf32>,
      %cst_35 = arith.constant 0.000000e+00 : f32
      %39 = vector.broadcast %cst_35 : f32 to vector<8x8xf32>
      %c0_36 = arith.constant 0 : index
      %c0_37 = arith.constant 0 : index
      %40 = vector.load %arg10[%c0_36, %c0_37] : memref<8x8xf32, #tpu.memory_space<vmem>>, vector<8x8xf32>
      tpu.vector_store %arg10[%c0_36, %c0_37], %39 {strides = array<i32>} : memref<8x8xf32, #tpu.memory_space<vmem>>, vector<8x8xf32>,
    } else {
    }
    %c0 = arith.constant 0 : index
    %c0_1 = arith.constant 0 : index
    %c0_2 = arith.constant 0 : index
    %c0_3 = arith.constant 0 : index
    %3 = vector.load %arg4[%c0, %c0_1, %c0_2, %c0_3] : memref<1x1x8x8xf32, #tpu.memory_space<vmem>>, vector<1x1x8x8xf32>
    %4 = vector.shape_cast %3 : vector<1x1x8x8xf32> to vector<8x8xf32>
    %c0_4 = arith.constant 0 : index
    %c0_5 = arith.constant 0 : index
    %c0_6 = arith.constant 0 : index
    %c0_7 = arith.constant 0 : index
    %5 = vector.load %arg5[%c0_4, %c0_5, %c0_6, %c0_7] : memref<1x1x8x8xf32, #tpu.memory_space<vmem>>, vector<1x1x8x8xf32>
    %6 = vector.shape_cast %5 : vector<1x1x8x8xf32> to vector<8x8xf32>
    %c0_8 = arith.constant 0 : index
    %c0_9 = arith.constant 0 : index
    %c0_10 = arith.constant 0 : index
    %c0_11 = arith.constant 0 : index
    %7 = vector.load %arg6[%c0_8, %c0_9, %c0_10, %c0_11] : memref<1x1x8x8xf32, #tpu.memory_space<vmem>>, vector<1x1x8x8xf32>
    %8 = vector.shape_cast %7 : vector<1x1x8x8xf32> to vector<8x8xf32>
    %cst = arith.constant dense<0.000000e+00> : vector<8x8xf32>
    %9 = tpu.matmul %4, %6, %cst {dimension_numbers = #tpu.dot_dimension_numbers<[1], [1], [0], [0], [0, 0, 1, 0], [], []>} : vector<8x8xf32>, vector<8x8xf32>, vector<8x8xf32> -> vector<8x8xf32>
    %c0_12 = arith.constant 0 : index
    %c0_13 = arith.constant 0 : index
    %10 = vector.load %arg8[%c0_12, %c0_13] : memref<8x1xf32, #tpu.memory_space<vmem>>, vector<8x1xf32>
    %cst_14 = arith.constant dense<0xFF800000> : vector<8xf32>
    %11 = vector.multi_reduction <maximumf>, %9, %cst_14 [1] : vector<8x8xf32> to vector<8xf32>
    %12 = vector.shape_cast %11 : vector<8xf32> to vector<8x1xf32>
    %13 = arith.maximumf %10, %12 : vector<8x1xf32>
    %14 = arith.subf %10, %13 : vector<8x1xf32>
    %15 = math.exp %14 : vector<8x1xf32>
    %16 = vector.broadcast %13 : vector<8x1xf32> to vector<8x8xf32>
    %17 = arith.subf %9, %16 : vector<8x8xf32>
    %18 = math.exp %17 : vector<8x8xf32>
    %c0_15 = arith.constant 0 : index
    %c0_16 = arith.constant 0 : index
    %19 = vector.load %arg9[%c0_15, %c0_16] : memref<8x1xf32, #tpu.memory_space<vmem>>, vector<8x1xf32>
    %20 = arith.mulf %15, %19 : vector<8x1xf32>
    %cst_17 = arith.constant dense<0.000000e+00> : vector<8xf32>
    %21 = vector.multi_reduction <add>, %18, %cst_17 [1] : vector<8x8xf32> to vector<8xf32>
    %22 = vector.shape_cast %21 : vector<8xf32> to vector<8x1xf32>
    %23 = arith.addf %20, %22 : vector<8x1xf32>
    %c0_18 = arith.constant 0 : index
    %c0_19 = arith.constant 0 : index
    %24 = vector.load %arg9[%c0_18, %c0_19] : memref<8x1xf32, #tpu.memory_space<vmem>>, vector<8x1xf32>
    tpu.vector_store %arg9[%c0_18, %c0_19], %23 {strides = array<i32>} : memref<8x1xf32, #tpu.memory_space<vmem>>, vector<8x1xf32>,
    %c0_20 = arith.constant 0 : index
    %c0_21 = arith.constant 0 : index
    %25 = vector.load %arg10[%c0_20, %c0_21] : memref<8x8xf32, #tpu.memory_space<vmem>>, vector<8x8xf32>
    %26 = vector.broadcast %15 : vector<8x1xf32> to vector<8x8xf32>
    %27 = arith.mulf %26, %25 : vector<8x8xf32>
    %cst_22 = arith.constant dense<0.000000e+00> : vector<8x8xf32>
    %28 = tpu.matmul %18, %8, %cst_22 {dimension_numbers = #tpu.dot_dimension_numbers<[1], [0], [0], [1], [0, 0, 1, 1], [], []>} : vector<8x8xf32>, vector<8x8xf32>, vector<8x8xf32> -> vector<8x8xf32>
    %29 = arith.addf %27, %28 : vector<8x8xf32>
    %c0_23 = arith.constant 0 : index
    %c0_24 = arith.constant 0 : index
    %30 = vector.load %arg10[%c0_23, %c0_24] : memref<8x8xf32, #tpu.memory_space<vmem>>, vector<8x8xf32>
    tpu.vector_store %arg10[%c0_23, %c0_24], %29 {strides = array<i32>} : memref<8x8xf32, #tpu.memory_space<vmem>>, vector<8x8xf32>,
    %c0_25 = arith.constant 0 : index
    %c0_26 = arith.constant 0 : index
    %31 = vector.load %arg8[%c0_25, %c0_26] : memref<8x1xf32, #tpu.memory_space<vmem>>, vector<8x1xf32>
    tpu.vector_store %arg8[%c0_25, %c0_26], %13 {strides = array<i32>} : memref<8x1xf32, #tpu.memory_space<vmem>>, vector<8x1xf32>,
    %c0_i32_27 = arith.constant 0 : i32
    %32 = arith.cmpi eq, %arg3, %c0_i32_27 : i32
    %33 = arith.extui %32 : i1 to i32
    %c0_i32_28 = arith.constant 0 : i32
    %34 = arith.cmpi ne, %33, %c0_i32_28 : i32
    scf.if %34 {
      %c0_29 = arith.constant 0 : index
      %c0_30 = arith.constant 0 : index
      %35 = vector.load %arg9[%c0_29, %c0_30] : memref<8x1xf32, #tpu.memory_space<vmem>>, vector<8x1xf32>
      %36 = tpu.reciprocal %35 {approx = true} : vector<8x1xf32> -> vector<8x1xf32>
      %c0_31 = arith.constant 0 : index
      %c0_32 = arith.constant 0 : index
      %37 = vector.load %arg10[%c0_31, %c0_32] : memref<8x8xf32, #tpu.memory_space<vmem>>, vector<8x8xf32>
      %38 = vector.broadcast %36 : vector<8x1xf32> to vector<8x8xf32>
      %39 = arith.mulf %37, %38 : vector<8x8xf32>
      %c0_33 = arith.constant 0 : index
      %c0_34 = arith.constant 0 : index
      %c0_35 = arith.constant 0 : index
      %c0_36 = arith.constant 0 : index
      %40 = vector.load %arg7[%c0_33, %c0_34, %c0_35, %c0_36] : memref<1x1x8x8xf32, #tpu.memory_space<vmem>>, vector<1x1x8x8xf32>
      %41 = vector.shape_cast %40 : vector<1x1x8x8xf32> to vector<8x8xf32>
      %42 = vector.shape_cast %39 : vector<8x8xf32> to vector<1x1x8x8xf32>
      tpu.vector_store %arg7[%c0_33, %c0_34, %c0_35, %c0_36], %42 {strides = array<i32>} : memref<1x1x8x8xf32, #tpu.memory_space<vmem>>, vector<1x1x8x8xf32>,
    } else {
    }
    return
  }
  func.func @transform_0(%arg0: i32, %arg1: i32, %arg2: i32, %arg3: i32) -> (i32, i32, i32, i32) {
    %c0_i32 = arith.constant 0 : i32
    %c0_i32_0 = arith.constant 0 : i32
    return %arg1, %arg0, %arg2, %c0_i32 : i32, i32, i32, i32
  }
  func.func @transform_1(%arg0: i32, %arg1: i32, %arg2: i32, %arg3: i32) -> (i32, i32, i32, i32) {
    %c4_i32 = arith.constant 4 : i32
    %0 = arith.addi %c4_i32, %arg1 : i32
    %c0_i32 = arith.constant 0 : i32
    %c0_i32_0 = arith.constant 0 : i32
    return %0, %arg0, %arg3, %c0_i32 : i32, i32, i32, i32
  }
  func.func @transform_2(%arg0: i32, %arg1: i32, %arg2: i32, %arg3: i32) -> (i32, i32, i32, i32) {
    %c8_i32 = arith.constant 8 : i32
    %0 = arith.addi %c8_i32, %arg1 : i32
    %c0_i32 = arith.constant 0 : i32
    %c0_i32_0 = arith.constant 0 : i32
    return %0, %arg0, %arg3, %c0_i32 : i32, i32, i32, i32
  }
  func.func @transform_3(%arg0: i32, %arg1: i32, %arg2: i32, %arg3: i32) -> (i32, i32, i32, i32) {
    %c0_i32 = arith.constant 0 : i32
    %c0_i32_0 = arith.constant 0 : i32
    return %arg0, %arg1, %arg2, %c0_i32 : i32, i32, i32, i32
  }
}

module attributes {stable_mosaic.version = 11 : i64} {
  func.func @_linear_kernel(%arg0: i32, %arg1: i32, %arg2: i32, %arg3: memref<16x32xf32, #tpu.memory_space<vmem>>, %arg4: memref<32x32xf32, #tpu.memory_space<vmem>>, %arg5: memref<1x32xf32, #tpu.memory_space<vmem>>, %arg6: memref<16x32xf32, #tpu.memory_space<vmem>>, %arg7: memref<16x32xf32, #tpu.memory_space<vmem>>) attributes {dimension_semantics = [#tpu.dimension_semantics<parallel>, #tpu.dimension_semantics<parallel>, #tpu.dimension_semantics<arbitrary>], iteration_bounds = array<i64: 1, 1, 1>, scalar_prefetch = 0 : i64, scratch_operands = 1 : i64, tpu.core_type = #tpu.core_type<tc>, window_params = [{transform_indices = @transform_0, window_bounds = array<i64: 16, 32>}, {transform_indices = @transform_1, window_bounds = array<i64: 32, 32>}, {transform_indices = @transform_2, window_bounds = array<i64: 1, 32>}, {transform_indices = @transform_3, window_bounds = array<i64: 16, 32>}]} {
    %c0_i32 = arith.constant 0 : i32
    %0 = arith.cmpi eq, %arg2, %c0_i32 : i32
    %1 = arith.extui %0 : i1 to i32
    %c0_i32_0 = arith.constant 0 : i32
    %2 = arith.cmpi ne, %1, %c0_i32_0 : i32
    scf.if %2 {
      %cst_10 = arith.constant 0.000000e+00 : f32
      %12 = vector.broadcast %cst_10 : f32 to vector<16x32xf32>
      %c0_11 = arith.constant 0 : index
      %c0_12 = arith.constant 0 : index
      %13 = vector.load %arg7[%c0_11, %c0_12] : memref<16x32xf32, #tpu.memory_space<vmem>>, vector<16x32xf32>
      tpu.vector_store %arg7[%c0_11, %c0_12], %12 {strides = array<i32>} : memref<16x32xf32, #tpu.memory_space<vmem>>, vector<16x32xf32>,
    } else {
    }
    %c0 = arith.constant 0 : index
    %c0_1 = arith.constant 0 : index
    %3 = vector.load %arg7[%c0, %c0_1] : memref<16x32xf32, #tpu.memory_space<vmem>>, vector<16x32xf32>
    %c0_2 = arith.constant 0 : index
    %c0_3 = arith.constant 0 : index
    %4 = vector.load %arg3[%c0_2, %c0_3] : memref<16x32xf32, #tpu.memory_space<vmem>>, vector<16x32xf32>
    %c0_4 = arith.constant 0 : index
    %c0_5 = arith.constant 0 : index
    %5 = vector.load %arg4[%c0_4, %c0_5] : memref<32x32xf32, #tpu.memory_space<vmem>>, vector<32x32xf32>
    %cst = arith.constant dense<0.000000e+00> : vector<16x32xf32>
    %6 = tpu.matmul %4, %5, %cst {dimension_numbers = #tpu.dot_dimension_numbers<[1], [0], [0], [1], [0, 0, 1, 1], [], []>} : vector<16x32xf32>, vector<32x32xf32>, vector<16x32xf32> -> vector<16x32xf32>
    %7 = arith.addf %3, %6 : vector<16x32xf32>
    %c0_6 = arith.constant 0 : index
    %c0_7 = arith.constant 0 : index
    %8 = vector.load %arg7[%c0_6, %c0_7] : memref<16x32xf32, #tpu.memory_space<vmem>>, vector<16x32xf32>
    tpu.vector_store %arg7[%c0_6, %c0_7], %7 {strides = array<i32>} : memref<16x32xf32, #tpu.memory_space<vmem>>, vector<16x32xf32>,
    %c0_i32_8 = arith.constant 0 : i32
    %9 = arith.cmpi eq, %arg2, %c0_i32_8 : i32
    %10 = arith.extui %9 : i1 to i32
    %c0_i32_9 = arith.constant 0 : i32
    %11 = arith.cmpi ne, %10, %c0_i32_9 : i32
    scf.if %11 {
      %c0_10 = arith.constant 0 : index
      %c0_11 = arith.constant 0 : index
      %12 = vector.load %arg7[%c0_10, %c0_11] : memref<16x32xf32, #tpu.memory_space<vmem>>, vector<16x32xf32>
      %c0_12 = arith.constant 0 : index
      %c0_13 = arith.constant 0 : index
      %13 = vector.load %arg5[%c0_12, %c0_13] : memref<1x32xf32, #tpu.memory_space<vmem>>, vector<1x32xf32>
      %14 = vector.broadcast %13 : vector<1x32xf32> to vector<16x32xf32>
      %15 = arith.addf %12, %14 : vector<16x32xf32>
      %c0_14 = arith.constant 0 : index
      %c0_15 = arith.constant 0 : index
      %16 = vector.load %arg6[%c0_14, %c0_15] : memref<16x32xf32, #tpu.memory_space<vmem>>, vector<16x32xf32>
      tpu.vector_store %arg6[%c0_14, %c0_15], %15 {strides = array<i32>} : memref<16x32xf32, #tpu.memory_space<vmem>>, vector<16x32xf32>,
    } else {
    }
    return
  }
  func.func @transform_0(%arg0: i32, %arg1: i32, %arg2: i32) -> (i32, i32) {
    %c0_i32 = arith.constant 0 : i32
    return %arg0, %arg2 : i32, i32
  }
  func.func @transform_1(%arg0: i32, %arg1: i32, %arg2: i32) -> (i32, i32) {
    %c0_i32 = arith.constant 0 : i32
    return %arg2, %arg1 : i32, i32
  }
  func.func @transform_2(%arg0: i32, %arg1: i32, %arg2: i32) -> (i32, i32) {
    %c0_i32 = arith.constant 0 : i32
    %c0_i32_0 = arith.constant 0 : i32
    return %c0_i32, %arg1 : i32, i32
  }
  func.func @transform_3(%arg0: i32, %arg1: i32, %arg2: i32) -> (i32, i32) {
    %c0_i32 = arith.constant 0 : i32
    return %arg0, %arg1 : i32, i32
  }
}

</mosaic_0001>

<bundles_post_ra>
// kernel: multihead_attention_forward.4
= control target key start
LH: loop header
LB: loop body
LE: loop exit
PB: predicated region body
PF: predicated region fallthrough
CT: control target
= control target key end

     0   :  { %s722_s12 = smov 0   ;;  %s724_s13 = smov 0   ;;  %s805_s0 = inlined_call_operand.vmem [shape: f32[12,2,8,8], index: 0, kind: input, shape index: {}, may-alias: {0,1,2}]   ;;  %s806_s1 = inlined_call_operand.vmem [shape: f32[12,2,8,8], index: 1, kind: input, shape index: {}, may-alias: {0,1,2}]   ;;  %s807_s2 = inlined_call_operand.vmem [shape: f32[12,2,8,8], index: 2, kind: input, shape index: {}, may-alias: {0,1,2}]   ;;  %s808_s3 = inlined_call_operand.vmem [shape: f32[2,4,8,8], index: 3, kind: output, shape index: {}]  }
   0x1   :  { %s726_s14 = smov 0   ;;  %s728_s15 = smov 0  }
   0x2   :  { %s730_s16 = smov 0  }
   0x3 LB: > { %s35_s17 = sadd.s32 1, %s689_s14  ;;  %s39_s18 = sadd.s32 1, %s693_s15  ;;  %s697_s16 = sphi %s730_s16, %s13_s16   ;;  %s693_s15 = sphi %s728_s15, %s812_s15   ;;  %s689_s14 = sphi %s726_s14, %s811_s14   ;;  %s685_s13 = sphi %s724_s13, %s810_s13   ;;  %s681_s12 = sphi %s722_s12, %s809_s12  }
   0x4   : > { %p37_p0 = scmp.ge.s32.totalorder %s35_s17, 4  ;;  %p593_p1 = scmp.ge.s32.totalorder %s697_s16, 1 }
   0x5   : > { %p225_p2 = scmp.lt.s32.totalorder %s697_s16, 9 }
   0x6   : > { %s814_s17 = smov (%p37_p0, %s35_s17), 0  ;;  %s816_s18 = smov (!%p37_p0, %s39_s18), %s693_s15 }
   0x7   : > { %p226_p3 = pnand %p593_p1, %p225_p2  ;;  %p41_p4 = scmp.ge.s32.totalorder %s816_s18, 2 }
   0x8   : > { %p287_p5 = scmp.lt.s32.totalorder (!%p226_p3), %s685_s13, 1  ;;  %s296_s19 = sadd.s32 (!%p226_p3), 4, %s681_s12 }
   0x9   : > { %s818_s18 = smov (%p41_p4, %s816_s18), 0  ;;  %229 = sbr.rel (%p226_p3) target bundleno = 623 (0x26f), region = 32 }
   0xa   : > { %p297_p6 = scmp.lt.s32.totalorder (!%p226_p3), %s296_s19, 11  ;;  %p285_p7 = scmp.lt.s32.totalorder (!%p226_p3), %s681_s12, 11 }
   0xb   : > { %s309_s6 = sadd.s32 (!%p226_p3), 8, %s681_s12  ;;  %p324_p9 = scmp.lt.s32.totalorder (!%p226_p3), %s681_s12, 3 }
   0xc   : > { %p310_p8 = scmp.lt.s32.totalorder (!%p226_p3), %s309_s6, 11 }
   0xe   : > { %s820_s13 = smov (!%p287_p5, %s685_s13), 1  ;;  %s822_s19 = smov (!%p297_p6, %s296_s19), 11  ;;  %vm340_vm0 = vcmask 64512   ;;  %vm337_vm1 = vcmask 7168   ;;  %v699_v2 = vmov -inf   ;;  %v700_v5 = vmov 0  }
   0xf   : > { %s286_s20 = scalar_select %p285_p7, %s681_s12, 11  ;;  %338 = vst.msk [vmem:[#allocation2] sm:$0xff] %vm337_vm1, %v699_v2  ;;  %650 = vset.pattern.permute.xlu0 %v700_v5  ;;  %651 = vset.pattern.permute.xlu1 %v700_v5  ;;  %v701_v6 = vmov 0.0  }
  0x10   : > { %s596_s21 = sshll.u32 %s822_s19, 1  ;;  %652 = vset.pattern.permute.xlu2 %v700_v5  ;;  %339 = vst.msk [vmem:[#allocation3] sm:$0xff] %vm337_vm1, %v701_v6  ;;  %s824_s6 = smov (!%p310_p8, %s309_s6), 11 }
  0x11   : > { %s305_s22 = sadd.s32 %s596_s21, %s820_s13  ;;  %s594_s23 = sshll.u32 %s286_s20, 1  ;;  %341 = vst.msk [vmem:[#allocation4] sm:$0xff] %vm340_vm0, %v701_v6 }
  0x12   : > { %s597_s24 = sshll.u32 %s305_s22, 3  ;;  %s293_s25 = sadd.s32 %s594_s23, %s820_s13 }
  0x13   : > { %s307_s28 = scalar_lea.vmem %s806_s1, %s597_s24  ;;  %s595_s29 = sshll.u32 %s293_s25, 3 }
  0x14   : > { %v343_v0 = vld [vmem:[%s307_s28] sm:$0xff]  ;;  %s295_s5 = scalar_lea.vmem %s805_s0, %s595_s29  ;;  %s598_s7 = sshll.u32 %s824_s6, 1 }
  0x15   : > { %602 = vmatpush.xpose.msk.msra.mxu0 %vm340_vm0, %v343_v0  ;;  %v342_v1 = vld [vmem:[%s295_s5] sm:$0xff]  ;;  %s318_s8 = sadd.s32 %s598_s7, %s820_s13  ;;  %s826_s12 = smov (!%p324_p9, %s681_s12), 3 }
  0x16   : > { %v372_v7 = vld [vmem:[#allocation2] sm:$0xff]  ;;  %s599_s9 = sshll.u32 %s318_s8, 3  ;;  %s600_s20 = sshll.u32 %s820_s13, 2 }
  0x17   : > { %s320_s19 = scalar_lea.vmem %s807_s2, %s599_s9  ;;  %v388_v19 = vld [vmem:[#allocation3] sm:$0xff]  ;;  %s330_s21 = sadd.s32 %s600_s20, %s826_s12 }
  0x18   : > { %603 = vmatmul.msk.f32.vlgmr.msra.gmra.mxu0 %vm340_vm0, %v342_v1  ;;  %v344_v11 = vld [vmem:[%s320_s19] sm:$0xff]  ;;  %v396_v25 = vld [vmem:[#allocation4] sm:$0xff]  ;;  %s601_s22 = sshll.u32 %s330_s21, 3 }
  0x19   : > { %421 = vmatpush.msra.mxu1 %v344_v11  ;;  %s332_s25 = scalar_lea.vmem %s808_s3, %s601_s22 }
  0x95   : > { %v369_v3 = vpop.f32.mrf.mxu0 }
  0x96   : > { %v373_v4 = vsel %vm340_vm0, %v369_v3, -inf }
  0x97   : > { %374 = vmax.xlane.f32.xlu0 %v373_v4 }
 0x10a   : > { %v375_v8 = vpop.xlane.xlu0 %374 }
 0x10b   : > { %v376_v9 = vmax.f32 %v372_v7, %v375_v8 }
 0x10d   : > { %v377_v10 = vsub.f32 %v372_v7, %v376_v9  ;;  %428 = vst.msk [vmem:[#allocation2] sm:$0xff] %vm337_vm1, %v376_v9  ;;  %382 = vperm.xlu0 %650, %v376_v9  }
 0x10f   : > { %v378_v17 = vmul.f32 1.442695, %v377_v10 }
 0x17f   : > { %v383_v12 = vpop.permute.xlu0 %382 }
 0x180   : > { %v385_v13 = vsub.f32 %v369_v3, %v383_v12 }
 0x182   : > { %v386_v14 = vmul.f32 1.442695, %v385_v13 }
 0x184   : > { %653 = vpow2.f32 %v386_v14 }
 0x185   : > { %655 = vpow2.f32 %v378_v17 }
 0x18a   : > { %v654_v15 = vpop.eup %653 }
 0x18b   : > { %604 = vmatmul.msk.f32.vlgmr.msra.gmra.mxu1 %vm340_vm0, %v654_v15  ;;  %v390_v16 = vsel %vm340_vm0, %v654_v15, 0.0  ;;  %v656_v18 = vpop.eup %655 }
 0x18c   : > { %391 = vadd.xlane.f32.xlu1 %v390_v16  ;;  %v389_v20 = vmul.f32 %v656_v18, %v388_v19 }
 0x1a5   : > { %399 = vperm.xlu1 %651, %v656_v18  }
 0x1ff   : > { %v392_v21 = vpop.xlane.xlu1 %391 }
 0x200   : > { %v393_v22 = vadd.f32 %v392_v21, %v389_v20 }
 0x202   : > { %395 = vst.msk [vmem:[#allocation3] sm:$0xff] %vm337_vm1, %v393_v22 }
 0x208   : > { %v423_v28 = vpop.f32.mrf.mxu1 }
 0x209   : > { %v432_v23 = vld [vmem:[#allocation3] sm:$0xff] }
 0x20a   : > { %657 = vrcp.f32 %v432_v23 }
 0x210   : > { %v658_v24 = vpop.eup %657 }
 0x211   : > { %437 = vperm.xlu2 %652, %v658_v24  }
 0x217   : > { %v400_v26 = vpop.permute.xlu1 %399 }
 0x218   : > { %v402_v27 = vmul.f32 %v400_v26, %v396_v25 }
 0x21a   : > { %v426_v29 = vadd.f32 %v423_v28, %v402_v27 }
 0x21c   : > { %427 = vst.msk [vmem:[#allocation4] sm:$0xff] %vm340_vm0, %v426_v29 }
 0x223   : > { %v434_v30 = vld [vmem:[#allocation4] sm:$0xff] }
 0x26b   : > { %v438_v31 = vpop.permute.xlu2 %437 }
 0x26c   : > { %v440_v32 = vmul.f32 %v438_v31, %v434_v30 }
 0x26e   : > { %441 = vst.msk [vmem:[%s332_s25] sm:$0xff] %vm340_vm0, %v440_v32 }
 0x26f PF: > { %s13_s16 = sadd.s32 1, %s697_s16   ;;  %s809_s12 = smov %s689_s14 }
 0x270   : > { %p10_p10 = scmp.ge.s32.totalorder %s13_s16, 10   ;;  %s810_s13 = smov %s693_s15 }
 0x271   : > { %s811_s14 = smov %s814_s17  ;;  %s812_s15 = smov %s818_s18 }
 0x272   :  { %12 = sbr.rel (!%p10_p10) target bundleno = 3 (0x3), region = 76 }

// kernel: multihead_attention_forward.3
= control target key start
LH: loop header
LB: loop body
LE: loop exit
PB: predicated region body
PF: predicated region fallthrough
CT: control target
= control target key end

     0   :  { %s515_s12 = smov 0   ;;  %s517_s13 = smov 0   ;;  %s572_s0 = inlined_call_operand.vmem [shape: f32[2,8,32], index: 0, kind: input, shape index: {}]   ;;  %s573_s1 = inlined_call_operand.vmem [shape: f32[12,32,8], index: 1, kind: input, shape index: {}]   ;;  %s574_s2 = inlined_call_operand.vmem [shape: f32[12,1,8], index: 2, kind: input, shape index: {}]   ;;  %s575_s3 = inlined_call_operand.vmem [shape: f32[12,2,8,8], index: 3, kind: output, shape index: {}]  }
   0x1   :  { %s519_s14 = smov 0   ;;  %s521_s15 = smov 0  }
   0x2   :  { %s523_s16 = smov 0  }
   0x3 LB: > { %s25_s17 = sadd.s32 1, %s485_s14  ;;  %s32_s18 = sadd.s32 1, %s489_s15  ;;  %s493_s16 = sphi %s523_s16, %s13_s16   ;;  %s489_s15 = sphi %s521_s15, %s579_s15   ;;  %s485_s14 = sphi %s519_s14, %s578_s14   ;;  %s481_s13 = sphi %s517_s13, %s577_s13   ;;  %s477_s12 = sphi %s515_s12, %s576_s12  }
   0x4   : > { %p26_p0 = scmp.ge.s32.totalorder %s25_s17, 12  ;;  %p404_p1 = scmp.ge.s32.totalorder %s493_s16, 1 }
   0x5   : > { %p182_p2 = scmp.lt.s32.totalorder %s493_s16, 25 }
   0x6   : > { %s581_s17 = smov (%p26_p0, %s25_s17), 0  ;;  %s583_s18 = smov (!%p26_p0, %s32_s18), %s489_s15 }
   0x7   : > { %p183_p3 = pnand %p404_p1, %p182_p2  ;;  %p34_p4 = scmp.ge.s32.totalorder %s583_s18, 2 }
   0x8   : > { %p229_p5 = scmp.lt.s32.totalorder (!%p183_p3), %s477_s12, 11  ;;  %p222_p6 = scmp.lt.s32.totalorder (!%p183_p3), %s481_s13, 1 }
   0x9   : > { %s585_s18 = smov (%p34_p4, %s583_s18), 0  ;;  %186 = sbr.rel (%p183_p3) target bundleno = 154 (0x9a), region = 32 }
   0xe   : > { %s587_s12 = smov (!%p229_p5, %s477_s12), 11  ;;  %s589_s13 = smov (!%p222_p6, %s481_s13), 1  ;;  %vm257_vm0 = vcmask 261120   ;;  %vm281_vm1 = vcmask 64512  }
   0xf   : > { %s413_s19 = sshll.u32 %s587_s12, 5  ;;  %s408_s20 = sshll.u32 %s587_s12, 1 }
  0x10   : > { %s233_s23 = scalar_lea.vmem %s573_s1, %s413_s19  ;;  %s405_s24 = sshll.u32 %s589_s13, 3 }
  0x11   : > { %v252_v0 = vld [vmem:[%s233_s23 + $0x18] sm:$0xff]  ;;  %v251_v1 = vld [vmem:[%s233_s23 + $0x10] sm:$0xff]  ;;  %s245_s25 = sadd.s32 %s408_s20, %s589_s13  ;;  %s236_s28 = scalar_lea.vmem %s574_s2, %s587_s12  ;;  %v250_v2 = vld [vmem:[%s233_s23 + $0x8] sm:$0xff] }
  0x12   : > { %273 = vmatpush.msra.mxu0 %v252_v0  ;;  %s228_s4 = scalar_lea.vmem %s572_s0, %s405_s24  ;;  %v249_v3 = vld [vmem:[%s233_s23] sm:$0xff]  ;;  %s409_s5 = sshll.u32 %s245_s25, 3 }
  0x13   : > { %v248_v4 = vld [vmem:[%s228_s4] sm:$0xff]  ;;  %s247_s8 = scalar_lea.vmem %s575_s3, %s409_s5 }
  0x14   : > { %274 = vmatpush.msra.mxu0 %v251_v1  ;;  %v454_v5 = vld [vmem:[%s236_s28] ss:$0 sm:$0xff] }
  0x16   : > { %275 = vmatpush.msra.mxu0 %v250_v2 }
  0x18   : > { %276 = vmatpush.msra.mxu0 %v249_v3 }
  0x19   : > { %410 = vmatmul.msk.f32.vlgmr.msra.gmra.mxu0 %vm257_vm0, %v248_v4 }
  0x96   : > { %v278_v6 = vpop.f32.mrf.mxu0 }
  0x97   : > { %v279_v7 = vadd.f32 %v454_v5, %v278_v6 }
  0x99   : > { %282 = vst.msk [vmem:[%s247_s8] sm:$0xff] %vm281_vm1, %v279_v7 }
  0x9a PF: > { %s13_s16 = sadd.s32 1, %s493_s16   ;;  %s576_s12 = smov %s485_s14 }
  0x9b   : > { %p10_p7 = scmp.ge.s32.totalorder %s13_s16, 26   ;;  %s577_s13 = smov %s489_s15 }
  0x9c   : > { %s578_s14 = smov %s581_s17  ;;  %s579_s15 = smov %s585_s18 }
  0x9d   :  { %12 = sbr.rel (!%p10_p7) target bundleno = 3 (0x3), region = 68 }

// kernel: multihead_attention_forward.5
= control target key start
LH: loop header
LB: loop body
LE: loop exit
PB: predicated region body
PF: predicated region fallthrough
CT: control target
= control target key end

     0   :  { %vm19_vm0 = vcmask 261120   ;;  %v132_v2 = vmov 0.0   ;;  %s188_s0 = inlined_call_operand.vmem [shape: f32[16,32], index: 0, kind: input, shape index: {}]   ;;  %s189_s1 = inlined_call_operand.vmem [shape: f32[32,32], index: 1, kind: input, shape index: {}]   ;;  %s190_s2 = inlined_call_operand.vmem [shape: f32[1,32], index: 2, kind: input, shape index: {}]   ;;  %s191_s3 = inlined_call_operand.hbm [shape: f32[16,32], index: 3, kind: output, shape index: {}]  }
   0x1   :  { %v29_v0 = vld [vmem:[%s189_s1 + $0x18] sm:$0xff]  ;;  %v28_v1 = vld [vmem:[%s189_s1 + $0x10] sm:$0xff]  ;;  %20 = vst.msk [vmem:[#allocation2] sm:$0xff] %vm19_vm0, %v132_v2  ;;  %v27_v3 = vld [vmem:[%s189_s1 + $0x8] sm:$0xff] }
   0x2   :  { %49 = vmatpush.msra.mxu0 %v29_v0  ;;  %97 = vmatpush.msra.mxu1 %v29_v0  ;;  %21 = vst.msk [vmem:[#allocation2 + $0x8] sm:$0xff] %vm19_vm0, %v132_v2 }
   0x3   :  { %8 = vsyncpa [#allocation4], 0  ;;  %v26_v4 = vld [vmem:[%s189_s1] sm:$0xff]  ;;  %v25_v6 = vld [vmem:[%s188_s0 + $0x8] sm:$0xff]  ;;  %s83_s28 = sshll.u32 %s191_s3, 4  ;;  %s134_s29 = smov 128   ;;  %s84_s28 = int_to_ptr.hbm [resolvable:$true] %s83_s28 }
   0x4   :  { %50 = vmatpush.msra.mxu0 %v28_v1  ;;  %98 = vmatpush.msra.mxu1 %v28_v1  ;;  %v24_v5 = vld [vmem:[%s188_s0] sm:$0xff]  ;;  %s133_s0 = smov [#allocation3]   ;;  %s135_s30 = smov 8  }
   0x5   :  { %v105_v13 = vld [vmem:[%s190_s2] ss:$0 sm:$0xff]  ;;  %s81_s25 = sshll.u32 %s133_s0, 4  ;;  %s82_s25 = int_to_ptr.vmem [resolvable:$true] %s81_s25 }
   0x6   :  { %51 = vmatpush.msra.mxu0 %v27_v3  ;;  %99 = vmatpush.msra.mxu1 %v27_v3 }
   0x8   :  { %52 = vmatpush.msra.mxu0 %v26_v4  ;;  %100 = vmatpush.msra.mxu1 %v26_v4  ;;  %v22_v7 = vld [vmem:[#allocation2] sm:$0xff] }
   0x9   :  { %95 = vmatmul.msk.f32.vlgmr.msra.gmra.mxu0 %vm19_vm0, %v24_v5  ;;  %96 = vmatmul.msk.f32.vlgmr.msra.gmra.mxu1 %vm19_vm0, %v25_v6  ;;  %v23_v8 = vld [vmem:[#allocation2 + $0x8] sm:$0xff] }
  0x86   :  { %v54_v9 = vpop.f32.mrf.mxu0  ;;  %v57_v10 = vpop.f32.mrf.mxu1 }
  0x87   :  { %v60_v11 = vadd.f32 %v54_v9, %v22_v7  ;;  %v61_v12 = vadd.f32 %v57_v10, %v23_v8 }
  0x89   :  { %62 = vst.msk [vmem:[#allocation2] sm:$0xff] %vm19_vm0, %v60_v11 }
  0x8a   :  { %63 = vst.msk [vmem:[#allocation2 + $0x8] sm:$0xff] %vm19_vm0, %v61_v12 }
  0x90   :  { %v67_v14 = vld [vmem:[#allocation2] sm:$0xff] }
  0x91   :  { %v68_v15 = vld [vmem:[#allocation2 + $0x8] sm:$0xff]  ;;  %v73_v16 = vadd.f32 %v105_v13, %v67_v14 }
  0x92   :  { %v74_v17 = vadd.f32 %v105_v13, %v68_v15 }
  0x93   :  { %75 = vst.msk [vmem:[#allocation3] sm:$0xff] %vm19_vm0, %v73_v16 }
  0x94   :  { %76 = vst.msk [vmem:[#allocation3 + $0x8] sm:$0xff] %vm19_vm0, %v74_v17 }
  0x95   :  { %89 = dma.vmem_to_hbm [thread:$0]  %s82_s25, 256, %s84_s28, [#allocation4], %s134_s29, %s134_s29, %s135_s30  }
  0x96   :  { %130 = dma.done.wait [#allocation4], 256  }
  0x97   :  { %131 = vsyncadd [#allocation4], 4294967040 }
  0x98   :  { %94 = vsyncpa [#allocation4], 1 }

</bundles_post_ra>
